<compile_context>
chip_gen: v7x
topology: tpu7x:2x2x1
jax: 0.10.0
libtpu: 0.0.40
codegen_flags: <defaults>
</compile_context>

<pallas_src>
import functools
import math

import jax
import jax.numpy as jnp
from jax import lax
from jax.experimental import pallas as pl
from jax.experimental.pallas import tpu as pltpu


def _sdpa_kernel(q_ref, k_ref, v_ref, ctx_ref, attn_ref,
                 p_strip, m_hist, m_sc, l_sc, acc_sc,
                 *, inv_sqrt_dim, tile_k, nk, mxu_dtype):
    """One (batch, q-tile, k-tile) grid step of flash-style SDPA."""
    ki = pl.program_id(2)

    @pl.when(ki == 0)
    def _init():
        m_sc[...] = jnp.full(m_sc.shape, -jnp.inf, m_sc.dtype)
        l_sc[...] = jnp.zeros(l_sc.shape, l_sc.dtype)
        acc_sc[...] = jnp.zeros(acc_sc.shape, acc_sc.dtype)

    # Fold 1/sqrt(D) into the (small, k-resident) query tile; cast MXU operands
    # to bf16 for f32 inputs, accumulate in f32.
    q = (q_ref[0] * inv_sqrt_dim).astype(mxu_dtype)      # (tile_q, D)
    k = k_ref[0].astype(mxu_dtype)                       # (tile_k, D)
    v = v_ref[0].astype(mxu_dtype)                       # (tile_k, Dv)

    # Score tile = q @ k^T, contracting on D of both operands (no k.T / XLU).
    s = lax.dot_general(q, k, (((1,), (1,)), ((), ())),
                        preferred_element_type=jnp.float32)   # (tile_q, tile_k)

    # Online softmax: the ONLY full-tile exp.
    m_prev = m_sc[...]
    m_new = jnp.maximum(m_prev, jnp.max(s, axis=-1, keepdims=True))
    alpha = jnp.exp(m_prev - m_new)                      # (tile_q, 1)
    p = jnp.exp(s - m_new)                               # (tile_q, tile_k) f32

    # Stash unnormalized probabilities (+ this step's max) for all but the last
    # k tile; finalize then needs only VPU rescales, never a second exp pass.
    @pl.when(ki < nk - 1)
    def _stash():
        p_strip[ki] = p.astype(p_strip.dtype)
        m_hist[ki] = m_new

    l_sc[...] = alpha * l_sc[...] + jnp.sum(p, axis=-1, keepdims=True)
    acc_sc[...] = alpha * acc_sc[...] + jnp.dot(
        p.astype(mxu_dtype), v, preferred_element_type=jnp.float32)
    m_sc[...] = m_new

    @pl.when(ki == nk - 1)
    def _finalize():
        m_fin = m_sc[...]
        inv_l = 1.0 / l_sc[...]                          # exact divide (rows sum to 1)
        ctx_ref[0] = (acc_sc[...] * inv_l).astype(ctx_ref.dtype)

        # Earlier k tiles: rescale the stashed probabilities by
        # exp(m_j - m_fin) / l.  Static unroll -> static, lane-aligned column
        # stores into the VMEM-resident (tile_q, Tk) attention block.
        for j in range(nk - 1):
            scale_j = jnp.exp(m_hist[j] - m_fin) * inv_l          # (tile_q, 1)
            attn_j = p_strip[j].astype(jnp.float32) * scale_j
            attn_ref[0, :, pl.ds(j * tile_k, tile_k)] = attn_j.astype(attn_ref.dtype)

        # Last k tile: its probabilities are still live (m_j == m_fin), so no
        # stash round-trip is needed.
        attn_ref[0, :, pl.ds((nk - 1) * tile_k, tile_k)] = (
            p * inv_l).astype(attn_ref.dtype)


def _pick_tile(n, max_tile, align):
    """Largest divisor of n that is <= max_tile, preferring align-multiples."""
    if n <= max_tile:
        return n
    start = max_tile - (max_tile % align)
    for t in range(start, 0, -align):
        if n % t == 0:
            return t
    for t in range(max_tile, 0, -1):
        if n % t == 0:
            return t
    return n


def _select_tiles(Tq, Tk, D, Dv, in_bytes, out_bytes, budget, batch):
    tile_q = _pick_tile(Tq, 256, 8)
    tile_k = _pick_tile(Tk, 512, 128)

    def usage(tq, tk):
        nk = max(Tk // tk, 1)
        attn_blocks = 2 * tq * Tk * out_bytes                 # resident attn out, x2 buffers
        strip = max(nk - 1, 1) * tq * tk * out_bytes          # unnormalized p stash
        m_hist = max(nk - 1, 1) * tq * 128 * 4                # per-step max (lane padded)
        qkv = 2 * tq * D * in_bytes + 2 * tk * (D + Dv) * in_bytes
        ctx = 2 * tq * Dv * out_bytes + tq * max(Dv, 128) * 4
        small = 3 * tq * 128 * 4
        return attn_blocks + strip + m_hist + qkv + ctx + small + (1 << 20)

    # K/V HBM re-read traffic scales with 1/tile_q, so shrink tile_k first
    # (512 -> 256 -> 128) and only then give up q-tile size.
    while usage(tile_q, tile_k) > budget:
        if tile_k > 256:
            tile_k = _pick_tile(Tk, tile_k // 2, 128)
        elif tile_q > 128:
            tile_q = _pick_tile(Tq, tile_q // 2, 8)
        elif tile_k > 128:
            tile_k = _pick_tile(Tk, tile_k // 2, 128)
        elif tile_q > 8:
            tile_q = _pick_tile(Tq, tile_q // 2, 8)
        else:
            break

    # Megacore (v7x has 2 TensorCores): ensure >= 2 blocks on the parallel
    # axes so neither core idles when B == 1.
    if batch * (Tq // tile_q) < 2 and tile_q > 8:
        smaller = _pick_tile(Tq, max(tile_q // 2, 8), 8)
        if smaller < tile_q:
            tile_q = smaller

    return tile_q, tile_k


def scaled_dot_product_attention(query, key, value, *, mxu_dtype=None):
    """Pallas implementation of ScaledDotProductAttention.forward."""
    B, Tq, D = query.shape
    Bk, Tk, Dk = key.shape
    Bv, Tkv, Dv = value.shape
    assert B == Bk == Bv and D == Dk and Tk == Tkv
    inv_sqrt_dim = 1.0 / math.sqrt(D)

    out_dtype = query.dtype
    if mxu_dtype is None:
        mxu_dtype = jnp.bfloat16 if query.dtype == jnp.float32 else query.dtype

    in_bytes = jnp.dtype(query.dtype).itemsize
    out_bytes = jnp.dtype(out_dtype).itemsize

    # Generation-aware VMEM sizing (v5e/v6e: 128 MiB, v7x: 64 MiB per core).
    try:
        vmem_cap = int(pltpu.get_tpu_info().vmem_capacity_bytes)
    except Exception:  # conservative fallback = v7x per-TensorCore capacity
        vmem_cap = 64 << 20
    vmem_limit = min((vmem_cap * 3) // 4, 64 << 20)
    budget = vmem_limit // 2          # headroom for compiler scratch / pipelining

    tile_q, tile_k = _select_tiles(Tq, Tk, D, Dv, in_bytes, out_bytes, budget, B)
    nq, nk = Tq // tile_q, Tk // tile_k

    kernel = functools.partial(
        _sdpa_kernel, inv_sqrt_dim=inv_sqrt_dim, tile_k=tile_k, nk=nk,
        mxu_dtype=mxu_dtype)

    out_shapes = (
        jax.ShapeDtypeStruct((B, Tq, Dv), out_dtype),    # context
        jax.ShapeDtypeStruct((B, Tq, Tk), out_dtype),    # attention matrix
    )

    grid_spec = pltpu.PrefetchScalarGridSpec(
        num_scalar_prefetch=0,
        grid=(B, nq, nk),
        in_specs=[
            pl.BlockSpec((1, tile_q, D), lambda b, qi, ki: (b, qi, 0)),
            pl.BlockSpec((1, tile_k, D), lambda b, qi, ki: (b, ki, 0)),
            pl.BlockSpec((1, tile_k, Dv), lambda b, qi, ki: (b, ki, 0)),
        ],
        out_specs=[
            pl.BlockSpec((1, tile_q, Dv), lambda b, qi, ki: (b, qi, 0)),
            # attn row-strip stays VMEM-resident across the k axis; fully
            # normalized values are written before the block flushes to HBM.
            pl.BlockSpec((1, tile_q, Tk), lambda b, qi, ki: (b, qi, 0)),
        ],
        scratch_shapes=[
            pltpu.VMEM((max(nk - 1, 1), tile_q, tile_k), out_dtype),  # unnorm. p
            pltpu.VMEM((max(nk - 1, 1), tile_q, 1), jnp.float32),     # per-step max
            pltpu.VMEM((tile_q, 1), jnp.float32),                     # running max
            pltpu.VMEM((tile_q, 1), jnp.float32),                     # running denom
            pltpu.VMEM((tile_q, Dv), jnp.float32),                    # ctx accumulator
        ],
    )

    return pl.pallas_call(
        kernel,
        out_shape=out_shapes,
        grid_spec=grid_spec,
        compiler_params=pltpu.CompilerParams(
            dimension_semantics=("parallel", "parallel", "arbitrary"),
            vmem_limit_bytes=int(vmem_limit)),
    )(query, key, value)


def _reference(query, key, value):
    d = query.shape[-1]
    score = jnp.einsum("bqd,bkd->bqk", query, key,
                       precision=lax.Precision.HIGHEST) / math.sqrt(d)
    attn = jax.nn.softmax(score, axis=-1)
    ctx = jnp.einsum("bqk,bkd->bqd", attn, value,
                     precision=lax.Precision.HIGHEST)
    return ctx, attn


if __name__ == "__main__":
    root = jax.random.PRNGKey(0)

    # --- Small shapes consistent with the module: B=2, seq=8, dim=32 ---
    kq, kk, kv = jax.random.split(jax.random.fold_in(root, 0), 3)
    B, Tq, Tk, D = 2, 8, 8, 32
    q = jax.random.normal(kq, (B, Tq, D), dtype=jnp.float32)
    k = jax.random.normal(kk, (B, Tk, D), dtype=jnp.float32)
    v = jax.random.normal(kv, (B, Tk, D), dtype=jnp.float32)

    ctx, attn = scaled_dot_product_attention(q, k, v)
    jax.block_until_ready((ctx, attn))
    ctx_ref, attn_ref = _reference(q, k, v)
    # bf16 MXU operands (f32 accumulation / f32 softmax): ~1e-3-level error.
    assert jnp.allclose(ctx, ctx_ref, atol=1e-2, rtol=1e-2)
    assert jnp.allclose(attn, attn_ref, atol=1e-2, rtol=1e-2)
    # Exact normalization (no approx reciprocal): rows sum to 1.
    assert jnp.allclose(jnp.sum(attn, axis=-1), 1.0, atol=1e-3)

    # --- Larger shape exercising the tiled flash path (nq > 1, nk > 1) ---
    kq2, kk2, kv2 = jax.random.split(jax.random.fold_in(root, 1), 3)
    B2, Tq2, Tk2, D2 = 2, 512, 1024, 64
    q2 = jax.random.normal(kq2, (B2, Tq2, D2), dtype=jnp.float32)
    k2 = jax.random.normal(kk2, (B2, Tk2, D2), dtype=jnp.float32)
    v2 = jax.random.normal(kv2, (B2, Tk2, D2), dtype=jnp.float32)

    ctx2, attn2 = scaled_dot_product_attention(q2, k2, v2)
    jax.block_until_ready((ctx2, attn2))
    ctx2_ref, attn2_ref = _reference(q2, k2, v2)
    assert jnp.allclose(ctx2, ctx2_ref, atol=2e-2, rtol=2e-2)
    assert jnp.allclose(attn2, attn2_ref, atol=2e-2, rtol=2e-2)
    assert jnp.allclose(jnp.sum(attn2, axis=-1), 1.0, atol=1e-3)

    print("KERNEL_OK")
</pallas_src>

<mosaic_0001>
module attributes {stable_mosaic.version = 11 : i64} {
  func.func @_sdpa_kernel(%arg0: i32, %arg1: i32, %arg2: i32, %arg3: memref<1x8x32xf32, #tpu.memory_space<vmem>>, %arg4: memref<1x8x32xf32, #tpu.memory_space<vmem>>, %arg5: memref<1x8x32xf32, #tpu.memory_space<vmem>>, %arg6: memref<1x8x32xf32, #tpu.memory_space<vmem>>, %arg7: memref<1x8x8xf32, #tpu.memory_space<vmem>>, %arg8: memref<1x8x8xf32, #tpu.memory_space<vmem>>, %arg9: memref<1x8x1xf32, #tpu.memory_space<vmem>>, %arg10: memref<8x1xf32, #tpu.memory_space<vmem>>, %arg11: memref<8x1xf32, #tpu.memory_space<vmem>>, %arg12: memref<8x32xf32, #tpu.memory_space<vmem>>) attributes {dimension_semantics = [#tpu.dimension_semantics<parallel>, #tpu.dimension_semantics<parallel>, #tpu.dimension_semantics<arbitrary>], iteration_bounds = array<i64: 2, 1, 1>, scalar_prefetch = 0 : i64, scratch_operands = 5 : i64, tpu.core_type = #tpu.core_type<tc>, window_params = [{transform_indices = @transform_0, window_bounds = array<i64: 1, 8, 32>}, {transform_indices = @transform_1, window_bounds = array<i64: 1, 8, 32>}, {transform_indices = @transform_2, window_bounds = array<i64: 1, 8, 32>}, {transform_indices = @transform_3, window_bounds = array<i64: 1, 8, 32>}, {transform_indices = @transform_4, window_bounds = array<i64: 1, 8, 8>}]} {
    %c0_i32 = arith.constant 0 : i32
    %0 = arith.cmpi eq, %arg2, %c0_i32 : i32
    %1 = arith.extui %0 : i1 to i32
    %c0_i32_0 = arith.constant 0 : i32
    %2 = arith.cmpi ne, %1, %c0_i32_0 : i32
    scf.if %2 {
      %cst_29 = arith.constant 0xFF800000 : f32
      %44 = vector.broadcast %cst_29 : f32 to vector<8x1xf32>
      %c0_30 = arith.constant 0 : index
      %c0_31 = arith.constant 0 : index
      %45 = vector.load %arg10[%c0_30, %c0_31] : memref<8x1xf32, #tpu.memory_space<vmem>>, vector<8x1xf32>
      tpu.vector_store %arg10[%c0_30, %c0_31], %44 {strides = array<i32>} : memref<8x1xf32, #tpu.memory_space<vmem>>, vector<8x1xf32>,
      %cst_32 = arith.constant 0.000000e+00 : f32
      %46 = vector.broadcast %cst_32 : f32 to vector<8x1xf32>
      %c0_33 = arith.constant 0 : index
      %c0_34 = arith.constant 0 : index
      %47 = vector.load %arg11[%c0_33, %c0_34] : memref<8x1xf32, #tpu.memory_space<vmem>>, vector<8x1xf32>
      tpu.vector_store %arg11[%c0_33, %c0_34], %46 {strides = array<i32>} : memref<8x1xf32, #tpu.memory_space<vmem>>, vector<8x1xf32>,
      %cst_35 = arith.constant 0.000000e+00 : f32
      %48 = vector.broadcast %cst_35 : f32 to vector<8x32xf32>
      %c0_36 = arith.constant 0 : index
      %c0_37 = arith.constant 0 : index
      %49 = vector.load %arg12[%c0_36, %c0_37] : memref<8x32xf32, #tpu.memory_space<vmem>>, vector<8x32xf32>
      tpu.vector_store %arg12[%c0_36, %c0_37], %48 {strides = array<i32>} : memref<8x32xf32, #tpu.memory_space<vmem>>, vector<8x32xf32>,
    } else {
    }
    %c0 = arith.constant 0 : index
    %c0_1 = arith.constant 0 : index
    %c0_2 = arith.constant 0 : index
    %3 = vector.load %arg3[%c0, %c0_1, %c0_2] : memref<1x8x32xf32, #tpu.memory_space<vmem>>, vector<1x8x32xf32>
    %4 = vector.shape_cast %3 : vector<1x8x32xf32> to vector<8x32xf32>
    %cst = arith.constant 0.176776692 : f32
    %5 = vector.broadcast %cst : f32 to vector<8x32xf32>
    %6 = arith.mulf %4, %5 : vector<8x32xf32>
    %7 = arith.truncf %6 : vector<8x32xf32> to vector<8x32xbf16>
    %c0_3 = arith.constant 0 : index
    %c0_4 = arith.constant 0 : index
    %c0_5 = arith.constant 0 : index
    %8 = vector.load %arg4[%c0_3, %c0_4, %c0_5] : memref<1x8x32xf32, #tpu.memory_space<vmem>>, vector<1x8x32xf32>
    %9 = vector.shape_cast %8 : vector<1x8x32xf32> to vector<8x32xf32>
    %10 = arith.truncf %9 : vector<8x32xf32> to vector<8x32xbf16>
    %c0_6 = arith.constant 0 : index
    %c0_7 = arith.constant 0 : index
    %c0_8 = arith.constant 0 : index
    %11 = vector.load %arg5[%c0_6, %c0_7, %c0_8] : memref<1x8x32xf32, #tpu.memory_space<vmem>>, vector<1x8x32xf32>
    %12 = vector.shape_cast %11 : vector<1x8x32xf32> to vector<8x32xf32>
    %13 = arith.truncf %12 : vector<8x32xf32> to vector<8x32xbf16>
    %cst_9 = arith.constant dense<0.000000e+00> : vector<8x8xf32>
    %14 = tpu.matmul %7, %10, %cst_9 {dimension_numbers = #tpu.dot_dimension_numbers<[1], [1], [0], [0], [0, 0, 1, 0], [], []>} : vector<8x32xbf16>, vector<8x32xbf16>, vector<8x8xf32> -> vector<8x8xf32>
    %c0_10 = arith.constant 0 : index
    %c0_11 = arith.constant 0 : index
    %15 = vector.load %arg10[%c0_10, %c0_11] : memref<8x1xf32, #tpu.memory_space<vmem>>, vector<8x1xf32>
    %cst_12 = arith.constant dense<0xFF800000> : vector<8xf32>
    %16 = vector.multi_reduction <maximumf>, %14, %cst_12 [1] : vector<8x8xf32> to vector<8xf32>
    %17 = vector.shape_cast %16 : vector<8xf32> to vector<8x1xf32>
    %18 = arith.maximumf %15, %17 : vector<8x1xf32>
    %19 = arith.subf %15, %18 : vector<8x1xf32>
    %20 = math.exp %19 : vector<8x1xf32>
    %21 = vector.broadcast %18 : vector<8x1xf32> to vector<8x8xf32>
    %22 = arith.subf %14, %21 : vector<8x8xf32>
    %23 = math.exp %22 : vector<8x8xf32>
    %c0_i32_13 = arith.constant 0 : i32
    %24 = arith.cmpi slt, %arg2, %c0_i32_13 : i32
    %25 = arith.extui %24 : i1 to i32
    %c0_i32_14 = arith.constant 0 : i32
    %26 = arith.cmpi ne, %25, %c0_i32_14 : i32
    scf.if %26 {
      %44 = arith.index_cast %arg2 : i32 to index
      %c0_29 = arith.constant 0 : index
      %c0_30 = arith.constant 0 : index
      %45 = vector.load %arg8[%44, %c0_29, %c0_30] : memref<1x8x8xf32, #tpu.memory_space<vmem>>, vector<1x8x8xf32>
      %46 = vector.shape_cast %45 : vector<1x8x8xf32> to vector<8x8xf32>
      %47 = vector.shape_cast %23 : vector<8x8xf32> to vector<1x8x8xf32>
      tpu.vector_store %arg8[%44, %c0_29, %c0_30], %47 {strides = array<i32>} : memref<1x8x8xf32, #tpu.memory_space<vmem>>, vector<1x8x8xf32>,
      %48 = arith.index_cast %arg2 : i32 to index
      %c0_31 = arith.constant 0 : index
      %c0_32 = arith.constant 0 : index
      %49 = vector.load %arg9[%48, %c0_31, %c0_32] : memref<1x8x1xf32, #tpu.memory_space<vmem>>, vector<1x8x1xf32>
      %50 = vector.shape_cast %49 : vector<1x8x1xf32> to vector<8x1xf32>
      %51 = vector.shape_cast %18 : vector<8x1xf32> to vector<1x8x1xf32>
      tpu.vector_store %arg9[%48, %c0_31, %c0_32], %51 {strides = array<i32>} : memref<1x8x1xf32, #tpu.memory_space<vmem>>, vector<1x8x1xf32>,
    } else {
    }
    %c0_15 = arith.constant 0 : index
    %c0_16 = arith.constant 0 : index
    %27 = vector.load %arg11[%c0_15, %c0_16] : memref<8x1xf32, #tpu.memory_space<vmem>>, vector<8x1xf32>
    %28 = arith.mulf %20, %27 : vector<8x1xf32>
    %cst_17 = arith.constant dense<0.000000e+00> : vector<8xf32>
    %29 = vector.multi_reduction <add>, %23, %cst_17 [1] : vector<8x8xf32> to vector<8xf32>
    %30 = vector.shape_cast %29 : vector<8xf32> to vector<8x1xf32>
    %31 = arith.addf %28, %30 : vector<8x1xf32>
    %c0_18 = arith.constant 0 : index
    %c0_19 = arith.constant 0 : index
    %32 = vector.load %arg11[%c0_18, %c0_19] : memref<8x1xf32, #tpu.memory_space<vmem>>, vector<8x1xf32>
    tpu.vector_store %arg11[%c0_18, %c0_19], %31 {strides = array<i32>} : memref<8x1xf32, #tpu.memory_space<vmem>>, vector<8x1xf32>,
    %c0_20 = arith.constant 0 : index
    %c0_21 = arith.constant 0 : index
    %33 = vector.load %arg12[%c0_20, %c0_21] : memref<8x32xf32, #tpu.memory_space<vmem>>, vector<8x32xf32>
    %34 = vector.broadcast %20 : vector<8x1xf32> to vector<8x32xf32>
    %35 = arith.mulf %34, %33 : vector<8x32xf32>
    %36 = arith.truncf %23 : vector<8x8xf32> to vector<8x8xbf16>
    %cst_22 = arith.constant dense<0.000000e+00> : vector<8x32xf32>
    %37 = tpu.matmul %36, %13, %cst_22 {dimension_numbers = #tpu.dot_dimension_numbers<[1], [0], [0], [1], [0, 0, 1, 1], [], []>} : vector<8x8xbf16>, vector<8x32xbf16>, vector<8x32xf32> -> vector<8x32xf32>
    %38 = arith.addf %35, %37 : vector<8x32xf32>
    %c0_23 = arith.constant 0 : index
    %c0_24 = arith.constant 0 : index
    %39 = vector.load %arg12[%c0_23, %c0_24] : memref<8x32xf32, #tpu.memory_space<vmem>>, vector<8x32xf32>
    tpu.vector_store %arg12[%c0_23, %c0_24], %38 {strides = array<i32>} : memref<8x32xf32, #tpu.memory_space<vmem>>, vector<8x32xf32>,
    %c0_25 = arith.constant 0 : index
    %c0_26 = arith.constant 0 : index
    %40 = vector.load %arg10[%c0_25, %c0_26] : memref<8x1xf32, #tpu.memory_space<vmem>>, vector<8x1xf32>
    tpu.vector_store %arg10[%c0_25, %c0_26], %18 {strides = array<i32>} : memref<8x1xf32, #tpu.memory_space<vmem>>, vector<8x1xf32>,
    %c0_i32_27 = arith.constant 0 : i32
    %41 = arith.cmpi eq, %arg2, %c0_i32_27 : i32
    %42 = arith.extui %41 : i1 to i32
    %c0_i32_28 = arith.constant 0 : i32
    %43 = arith.cmpi ne, %42, %c0_i32_28 : i32
    scf.if %43 {
      %c0_29 = arith.constant 0 : index
      %c0_30 = arith.constant 0 : index
      %44 = vector.load %arg11[%c0_29, %c0_30] : memref<8x1xf32, #tpu.memory_space<vmem>>, vector<8x1xf32>
      %cst_31 = arith.constant 1.000000e+00 : f32
      %45 = vector.broadcast %cst_31 : f32 to vector<8x1xf32>
      %46 = arith.divf %45, %44 : vector<8x1xf32>
      %c0_32 = arith.constant 0 : index
      %c0_33 = arith.constant 0 : index
      %47 = vector.load %arg12[%c0_32, %c0_33] : memref<8x32xf32, #tpu.memory_space<vmem>>, vector<8x32xf32>
      %48 = vector.broadcast %46 : vector<8x1xf32> to vector<8x32xf32>
      %49 = arith.mulf %47, %48 : vector<8x32xf32>
      %c0_34 = arith.constant 0 : index
      %c0_35 = arith.constant 0 : index
      %c0_36 = arith.constant 0 : index
      %50 = vector.load %arg6[%c0_34, %c0_35, %c0_36] : memref<1x8x32xf32, #tpu.memory_space<vmem>>, vector<1x8x32xf32>
      %51 = vector.shape_cast %50 : vector<1x8x32xf32> to vector<8x32xf32>
      %52 = vector.shape_cast %49 : vector<8x32xf32> to vector<1x8x32xf32>
      tpu.vector_store %arg6[%c0_34, %c0_35, %c0_36], %52 {strides = array<i32>} : memref<1x8x32xf32, #tpu.memory_space<vmem>>, vector<1x8x32xf32>,
      %53 = vector.broadcast %46 : vector<8x1xf32> to vector<8x8xf32>
      %54 = arith.mulf %23, %53 : vector<8x8xf32>
      %c0_37 = arith.constant 0 : index
      %c0_38 = arith.constant 0 : index
      %c0_39 = arith.constant 0 : index
      %55 = vector.load %arg7[%c0_37, %c0_38, %c0_39] : memref<1x8x8xf32, #tpu.memory_space<vmem>>, vector<1x8x8xf32>
      %56 = vector.shape_cast %55 : vector<1x8x8xf32> to vector<8x8xf32>
      %57 = vector.shape_cast %54 : vector<8x8xf32> to vector<1x8x8xf32>
      tpu.vector_store %arg7[%c0_37, %c0_38, %c0_39], %57 {strides = array<i32>} : memref<1x8x8xf32, #tpu.memory_space<vmem>>, vector<1x8x8xf32>,
    } else {
    }
    return
  }
  func.func @transform_0(%arg0: i32, %arg1: i32, %arg2: i32) -> (i32, i32, i32) {
    %c0_i32 = arith.constant 0 : i32
    %c0_i32_0 = arith.constant 0 : i32
    return %arg0, %arg1, %c0_i32 : i32, i32, i32
  }
  func.func @transform_1(%arg0: i32, %arg1: i32, %arg2: i32) -> (i32, i32, i32) {
    %c0_i32 = arith.constant 0 : i32
    %c0_i32_0 = arith.constant 0 : i32
    return %arg0, %arg2, %c0_i32 : i32, i32, i32
  }
  func.func @transform_2(%arg0: i32, %arg1: i32, %arg2: i32) -> (i32, i32, i32) {
    %c0_i32 = arith.constant 0 : i32
    %c0_i32_0 = arith.constant 0 : i32
    return %arg0, %arg2, %c0_i32 : i32, i32, i32
  }
  func.func @transform_3(%arg0: i32, %arg1: i32, %arg2: i32) -> (i32, i32, i32) {
    %c0_i32 = arith.constant 0 : i32
    %c0_i32_0 = arith.constant 0 : i32
    return %arg0, %arg1, %c0_i32 : i32, i32, i32
  }
  func.func @transform_4(%arg0: i32, %arg1: i32, %arg2: i32) -> (i32, i32, i32) {
    %c0_i32 = arith.constant 0 : i32
    %c0_i32_0 = arith.constant 0 : i32
    return %arg0, %arg1, %c0_i32 : i32, i32, i32
  }
}

</mosaic_0001>

<bundles_post_ra>
// kernel: tpu_custom_call.1
= control target key start
LH: loop header
LB: loop body
LE: loop exit
PB: predicated region body
PF: predicated region fallthrough
CT: control target
= control target key end

     0   :  { %s1379_s0 = inlined_call_operand.hbm [shape: f32[2,8,32], index: 0, kind: input, shape index: {}]   ;;  %s1380_s1 = inlined_call_operand.hbm [shape: f32[2,8,32], index: 1, kind: input, shape index: {}]   ;;  %s1381_s2 = inlined_call_operand.hbm [shape: f32[2,8,32], index: 2, kind: input, shape index: {}]   ;;  %s1382_s3 = inlined_call_operand.hbm [shape: f32[2,8,32], index: 3, kind: output, shape index: {0}]   ;;  %s1383_s4 = inlined_call_operand.hbm [shape: f32[2,8,8], index: 4, kind: output, shape index: {1}]  }
   0x1   :  { %1392 = sst [smem:[#allocation24_spill]] %s1380_s1 }
   0x2   :  { %10 = vsyncpa [#allocation8], 0 }
   0x3   :  { %12 = vsyncpa [#allocation8 + $0x1], 0 }
   0x4   :  { %13 = vsyncpa [#allocation11], 0 }
   0x5   :  { %15 = vsyncpa [#allocation11 + $0x1], 0 }
   0x6   :  { %16 = vsyncpa [#allocation9], 0 }
   0x7   :  { %18 = vsyncpa [#allocation9 + $0x1], 0 }
   0x8   :  { %19 = vsyncpa [#allocation15], 0 }
   0x9   :  { %21 = vsyncpa [#allocation15 + $0x1], 0  ;;  %s1072_s15 = smov 0   ;;  %s1074_s16 = smov 0  }
   0xa   :  { %s1076_s17 = smov 0   ;;  %s1078_s18 = smov 0  }
   0xb   :  { %s1080_s19 = smov 0   ;;  %s1082_s20 = smov 0  }
   0xc LB: > { %1393 = sst [smem:[#allocation20_spill]] %s1032_s19  ;;  %s1103_s21 = sadd.s32 4294967295, %s1036_s20   ;;  %s1036_s20 = sphi %s1082_s20, %s27_s20   ;;  %s1032_s19 = sphi %s1080_s19, %s1417_s19   ;;  %s1028_s18 = sphi %s1078_s18, %s1416_s18   ;;  %s1024_s17 = sphi %s1076_s17, %s1420_s17   ;;  %s1020_s16 = sphi %s1074_s16, %s1419_s16   ;;  %s1016_s15 = sphi %s1072_s15, %s1418_s15  }
   0xd   : > { %1394 = sst [smem:[#allocation21_spill]] %s1036_s20  ;;  %s700_s22 = sadd.s32 4294967294, %s1036_s20  }
   0xe   : > { %s46_s23 = sadd.s32 1, %s1032_s19  ;;  %s55_s24 = sadd.s32 1, %s1024_s17 }
   0xf   : > { %p48_p0 = scmp.ge.s32.totalorder %s46_s23, 2  ;;  %p62_p1 = scmp.ne.s32.totalorder %s1024_s17, %s1020_s16 }
  0x10   : > { %p63_p2 = scmp.eq.s32.totalorder %s1036_s20, 0  ;;  %p68_p3 = scmp.ne.s32.totalorder %s1020_s16, %s1016_s15 }
  0x11   : > { %s1422_s23 = smov (%p48_p0, %s46_s23), 0  ;;  %p69_p5 = scmp.eq.s32.totalorder %s1103_s21, 0 }
  0x12   : > { %1395 = sst [smem:[#allocation22_spill]] %s1422_s23  ;;  %p1115_p4 = por %p63_p2, %p62_p1 }
  0x13   : > { %s50_s26 = ssub.s32 %s1032_s19, %s1422_s23  ;;  %p150_p6 = scmp.eq.s32.totalorder %s1103_s21, 1 }
  0x14   : > { %p53_p7 = scmp.eq.s32.totalorder %s50_s26, 0  ;;  %p1123_p8 = por %p69_p5, %p68_p3 }
  0x15   : > { %p1127_p9 = por %p150_p6, %p62_p1  ;;  %p156_p10 = scmp.eq.s32.totalorder %s700_s22, 1 }
  0x16   : > { %s1397_s27 = scalar_select %p1123_p8, 1, 0 }
  0x17   : > { %s1398_s28 = scalar_select %p1127_p9, 1, 0 }
  0x18   : > { %s1132_s29 = scalar_select %p53_p7, %s1024_s17, %s55_s24  }
  0x19   : > { %p1134_p11 = por %p156_p10, %p68_p3  ;;  %p766_p13 = scmp.lt.s32.totalorder %s1036_s20, 2 }
  0x1a   : > { %1399 = sst [smem:[#allocation23_spill]] %s1132_s29  ;;  %s1384_s5 = sand.u32 1, %s1024_s17  }
  0x1b   : > { %s1400_s30 = scalar_select %p1134_p11, 1, 0 }
  0x1c   : > { %s1143_s6 = sshll.u32 %s1384_s5, 3  ;;  %s1146_s7 = sshll.u32 %s1032_s19, 7 }
  0x1d   : > { %p1150_p0 = pnand %p766_p13, %p1115_p4  ;;  %s223_s9 = sand.u32 1, %s1036_s20  }
  0x1e   : > { %s1402_s1 = sld [smem:[#allocation24_spill]]  ;;  %s227_s13 = scalar_lea.vmem [#allocation10], %s1143_s6 }
  0x1f   : > { %s1401_s8 = scalar_select %p1150_p0, 1, 0 }
  0x20   : > { %s235_s14 = sshll.u32 %s227_s13, 4  ;;  %s1166_s22 = scalar_lea.sflag [#allocation11], %s223_s9  ;;  %s1163_s14 = int_to_ptr.vmem [resolvable:$true] %s235_s14 }
  0x21   : > { %p1172_p4 = pneg %p1150_p0 }
  0x24   : > { %s1159_s12 = scalar_lea.hbm %s1402_s1, %s1146_s7  ;;  %s833_s11 = scalar_lea.hbm %s1402_s1, 256 }
  0x25   : > { %s828_s24 = scalar_lea.hbm %s1159_s12, 128  ;;  %p834_p7 = scmp.lt.u32.totalorder %s1159_s12, %s1402_s1 }
  0x26   : > { %p829_p3 = scmp.ne.s32.totalorder %s1159_s12, %s828_s24  ;;  %p835_p10 = scmp.lt.u32.totalorder %s833_s11, %s828_s24 }
  0x27   : > { %p837_p12 = scmp.lt.u32.totalorder %s828_s24, %s1159_s12 }
  0x28   : > { %p831_p5 = pnand %p1172_p4, %p829_p3  ;;  %p836_p13 = por %p835_p10, %p834_p7 }
  0x2a   : > { %p832_p6 = pneg %p831_p5  ;;  %p838_p1 = por %p837_p12, %p836_p13 }
  0x2c   : > { %p839_p2 = pnand %p838_p1, %p832_p6 }
  0x2e   : > { %842 = shalt.err (!%p839_p2)
}
  0x2f   : > { %s843_s9 = scalar_lea.vmem %s1163_s14, 128  ;;  %s1038_s26 = smov [#allocation10]  }
  0x30   : > { %p844_p3 = scmp.ne.s32.totalorder %s1163_s14, %s843_s9  ;;  %s848_s10 = sshll.u32 %s1038_s26, 4  ;;  %s849_s10 = int_to_ptr.vmem [resolvable:$false] %s848_s10 }
  0x31   : > { %s850_s5 = scalar_lea.vmem %s849_s10, 256  ;;  %p851_p9 = scmp.lt.s32.totalorder %s1163_s14, %s849_s10 }
  0x32   : > { %p846_p5 = pnand %p844_p3, %p1172_p4  ;;  %p852_p8 = scmp.lt.s32.totalorder %s850_s5, %s843_s9 }
  0x34   : > { %p847_p11 = pneg %p846_p5  ;;  %p853_p7 = por %p852_p8, %p851_p9 }
  0x36   : > { %p854_p10 = pnand %p853_p7, %p847_p11 }
  0x38   : > { %857 = shalt.err (!%p854_p10)
}
  0x39   : > { %755 = dma.hbm_to_vmem [thread:$0]  (!%p1150_p0), %s1159_s12, 128, %s1163_s14, %s1166_s22  }
  0x3a   : > { %p1404_p12 = scmp.lt.s32.totalorder %s1036_s20, 3  ;;  %p1405_p1 = scmp.ge.s32.totalorder %s1036_s20, 1 }
  0x3b   : > { %s1208_s9 = scalar_lea.hbm %s1379_s0, %s1146_s7  ;;  %s208_s26 = scalar_lea.vmem [#allocation7], %s1143_s6 }
  0x3c   : > { %p1200_p2 = pnand %p1405_p1, %p1404_p12  ;;  %s216_s10 = sshll.u32 %s208_s26, 4  ;;  %s1211_s10 = int_to_ptr.vmem [resolvable:$true] %s216_s10 }
  0x3d   : > { %s1217_s5 = scalar_lea.hbm %s1381_s2, %s1146_s7  ;;  %s1407_s1 = sand.u32 1, %s1024_s17  }
  0x3e   : > { %s1406_s24 = scalar_select %p1200_p2, 1, 0 }
  0x3f   : > { %s205_s23 = scalar_lea.sflag [#allocation8], %s1407_s1  ;;  %s858_s19 = scalar_lea.hbm %s1208_s9, 128 }
  0x40   : > { %p859_p8 = scmp.ne.s32.totalorder %s1208_s9, %s858_s19  ;;  %s863_s29 = scalar_lea.hbm %s1379_s0, 256 }
  0x41   : > { %p864_p6 = scmp.lt.u32.totalorder %s1208_s9, %s1379_s0  ;;  %p865_p13 = scmp.lt.u32.totalorder %s863_s29, %s858_s19 }
  0x42   : > { %p861_p9 = pnand %p859_p8, %p1172_p4  ;;  %p867_p5 = scmp.lt.u32.totalorder %s858_s19, %s1208_s9 }
  0x43   : > { %p866_p3 = por %p865_p13, %p864_p6 }
  0x44   : > { %p862_p11 = pneg %p861_p9 }
  0x45   : > { %p868_p7 = por %p867_p5, %p866_p3 }
  0x47   : > { %p869_p10 = pnand %p868_p7, %p862_p11 }
  0x49   : > { %872 = shalt.err (!%p869_p10)
}
  0x4a   : > { %s873_s1 = scalar_lea.vmem %s1211_s10, 128  ;;  %s1039_s7 = smov [#allocation7]  }
  0x4b   : > { %p874_p12 = scmp.ne.s32.totalorder %s1211_s10, %s873_s1  ;;  %s878_s12 = sshll.u32 %s1039_s7, 4  ;;  %s879_s12 = int_to_ptr.vmem [resolvable:$false] %s878_s12 }
  0x4c   : > { %s880_s20 = scalar_lea.vmem %s879_s12, 256  ;;  %p881_p9 = scmp.lt.s32.totalorder %s1211_s10, %s879_s12 }
  0x4d   : > { %p876_p1 = pnand %p874_p12, %p1172_p4  ;;  %p882_p2 = scmp.lt.s32.totalorder %s880_s20, %s873_s1 }
  0x4f   : > { %p877_p8 = pneg %p876_p1  ;;  %p883_p6 = por %p882_p2, %p881_p9 }
  0x51   : > { %p884_p13 = pnand %p883_p6, %p877_p8 }
  0x53   : > { %887 = shalt.err (!%p884_p13)
}
  0x54   : > { %752 = dma.hbm_to_vmem [thread:$0]  (!%p1150_p0), %s1208_s9, 128, %s1211_s10, %s205_s23  }
  0x55   : > { %s246_s19 = scalar_lea.vmem [#allocation12], %s1143_s6  ;;  %s888_s14 = scalar_lea.hbm %s1217_s5, 128 }
  0x56   : > { %s254_s29 = sshll.u32 %s246_s19, 4  ;;  %p889_p11 = scmp.ne.s32.totalorder %s1217_s5, %s888_s14  ;;  %s255_s29 = int_to_ptr.vmem [resolvable:$true] %s254_s29 }
  0x57   : > { %s893_s26 = scalar_lea.hbm %s1381_s2, 256  ;;  %p894_p5 = scmp.lt.u32.totalorder %s1217_s5, %s1381_s2 }
  0x58   : > { %p891_p2 = pnand %p889_p11, %p1172_p4  ;;  %p895_p7 = scmp.lt.u32.totalorder %s893_s26, %s888_s14 }
  0x59   : > { %p897_p12 = scmp.lt.u32.totalorder %s888_s14, %s1217_s5 }
  0x5a   : > { %p892_p3 = pneg %p891_p2  ;;  %p896_p10 = por %p895_p7, %p894_p5 }
  0x5c   : > { %p898_p1 = por %p897_p12, %p896_p10 }
  0x5e   : > { %p899_p8 = pnand %p898_p1, %p892_p3 }
  0x60   : > { %902 = shalt.err (!%p899_p8)
}
  0x61   : > { %s903_s23 = scalar_lea.vmem %s255_s29, 128  ;;  %s1040_s6 = smov [#allocation12]  }
  0x62   : > { %p904_p9 = scmp.ne.s32.totalorder %s255_s29, %s903_s23  ;;  %s908_s9 = sshll.u32 %s1040_s6, 4  ;;  %s909_s9 = int_to_ptr.vmem [resolvable:$false] %s908_s9 }
  0x63   : > { %s910_s10 = scalar_lea.vmem %s909_s9, 256  ;;  %p911_p11 = scmp.lt.s32.totalorder %s255_s29, %s909_s9 }
  0x64   : > { %p906_p6 = pnand %p904_p9, %p1172_p4  ;;  %p912_p2 = scmp.lt.s32.totalorder %s910_s10, %s903_s23 }
  0x66   : > { %p907_p13 = pneg %p906_p6  ;;  %p913_p0 = por %p912_p2, %p911_p11 }
  0x68   : > { %p914_p5 = pnand %p913_p0, %p907_p13 }
  0x6a   : > { %917 = shalt.err (!%p914_p5)
}
  0x6b   : > { %p1408_p7 = scmp.ne.s32.totalorder %s1401_s8, 0  ;;  %p1409_p3 = scmp.ne.s32.totalorder %s1406_s24, 0 }
  0x6c   : > { %s1264_s25 = sand.u32 (!%p1409_p3), 1, %s1020_s16   ;;  %p1410_p0 = scmp.ne.s32.totalorder (!%p1409_p3), %s1397_s27, 0 }
  0x6d   : > { %758 = dma.hbm_to_vmem [thread:$0]  (!%p1408_p7), %s1217_s5, 128, %s255_s29, %s1166_s22  }
  0x6e   : > { %263 = sbr.rel (%p1409_p3) target bundleno = 964 (0x3c4), region = 32  ;;  %s1267_s12 = sshll.u32 (!%p1409_p3), %s1264_s25, 3 }
  0x6f   : > { %s266_s20 = scalar_lea.sflag (!%p1409_p3), [#allocation8], %s1264_s25  ;;  %s269_s19 = scalar_lea.vmem (!%p1409_p3), [#allocation7], %s1267_s12 }
  0x75   : > { %999 = dma.done.wait (%p1410_p0), %s266_s20, 128  }
  0x76   : > { %1001 = vsyncadd (%p1410_p0), %s266_s20, 4294967168  ;;  %s274_s8 = sand.u32 1, %s1103_s21   ;;  %s278_s24 = scalar_lea.vmem [#allocation10], %s1267_s12 }
  0x77   : > { %s275_s22 = scalar_lea.sflag [#allocation11], %s274_s8 }
  0x78   : > { %1003 = dma.done.wait (%p1410_p0), %s275_s22, 256  }
  0x79   : > { %1005 = vsyncadd (%p1410_p0), %s275_s22, 4294967040  ;;  %vm335_vm0 = vcmask 261120   ;;  %v1041_v0 = vmov 0.0   ;;  %vm1042_vm1 = vmmov 0   ;;  %v340_v1 = vld [vmem:[%s278_s24] sm:$0xff]  ;;  %v337_v2 = vld [vmem:[%s269_s19] sm:$0xff] }
  0x7a   : > { %727 = vmatprep.subr.bf16.mxu0 %v1041_v0  ;;  %336 = vst.msk [vmem:[#allocation6] sm:$0xff] %vm335_vm0, %v1041_v0  ;;  %729 = vmatprep.mubr.msk.bf16.mxu0 %vm1042_vm1, %v1041_v0  ;;  %v341_v3 = vpack.c.bf16 %v340_v1, %v340_v1  ;;  %v338_v5 = vmul.f32 0.17677669, %v337_v2  ;;  %vm332_vm2 = vcmask 7168   ;;  %v1043_v7 = vmov -inf   ;;  %s287_s21 = scalar_lea.vmem [#allocation12], %s1267_s12 }
  0x7b   : > { %733 = vmatprep.subr.bf16.mxu1 %v1041_v0  ;;  %735 = vmatprep.mubr.msk.bf16.mxu1 %vm1042_vm1, %v1041_v0  ;;  %333 = vst.msk [vmem:[#allocation4] sm:$0xff] %vm332_vm2, %v1043_v7  ;;  %334 = vst.msk [vmem:[#allocation5] sm:$0xff] %vm332_vm2, %v1041_v0  ;;  %vm392_vm3 = vcmask 64512   ;;  %v1044_v13 = vmov 0   ;;  %v342_v18 = vld [vmem:[%s287_s21] sm:$0xff]  ;;  %vm437_vm4 = vcmask 1043456  }
  0x7c   : > { %v349_v4 = vsel %vm335_vm0, %v341_v3, 0  ;;  %v339_v6 = vpack.c.bf16 %v338_v5, %v338_v5  ;;  %820 = vset.pattern.permute.xlu0 %v1044_v13  ;;  %821 = vset.pattern.permute.xlu1 %v1044_v13  ;;  %v343_v19 = vpack.c.bf16 %v342_v18, %v342_v18  ;;  %s719_s27 = sshll.u32 %s1028_s18, 7  ;;  %s319_s5 = scalar_lea.vmem [#allocation13], %s1267_s12 }
  0x7d   : > { %728 = vmatpush3.bf16.xpose.msra.mxu0 %v349_v4  ;;  %s520_s29 = sshll.u32 %s319_s5, 4  ;;  %s326_s14 = scalar_lea.vmem [#allocation14], %s1267_s12  ;;  %s1301_s29 = int_to_ptr.vmem [resolvable:$true] %s520_s29 }
  0x7e   : > { %v439_v20 = vsel %vm437_vm4, %v343_v19, 0  ;;  %s534_s11 = sshll.u32 %s326_s14, 4  ;;  %s1299_s1 = scalar_lea.hbm %s1382_s3, %s719_s27  ;;  %s1308_s11 = int_to_ptr.vmem [resolvable:$true] %s534_s11 }
  0x7f   : > { %734 = vmatpush3.bf16.msra.mxu1 %v439_v20  ;;  %s1306_s18 = scalar_lea.hbm %s1383_s4, %s719_s27  ;;  %s501_s6 = scalar_lea.sflag [#allocation9], %s1264_s25 }
  0x80   : > { %s918_s9 = scalar_lea.vmem %s1301_s29, 128  ;;  %p1411_p10 = scmp.ne.s32.totalorder %s1398_s28, 0 }
  0x81   : > { %v426_v35 = vld [vmem:[#allocation6] sm:$0xff]  ;;  %p919_p4 = scmp.ne.s32.totalorder %s1301_s29, %s918_s9  ;;  %s1045_s10 = smov [#allocation13]  }
  0x82   : > { %v391_v14 = vld [vmem:[#allocation4] sm:$0xff]  ;;  %v418_v29 = vld [vmem:[#allocation5] sm:$0xff]  ;;  %s922_s12 = sshll.u32 %s1045_s10, 4  ;;  %s923_s12 = int_to_ptr.vmem [resolvable:$false] %s922_s12 }
  0x83   : > { %p920_p12 = pnand %p919_p4, %p1411_p10  ;;  %s924_s20 = scalar_lea.vmem %s923_s12, 256 }
  0x84   : > { %730 = vmatmul.mubr.msk.bf16.vlgmr.msra.gmra.mrb[0].mxu0 %vm335_vm0, %v339_v6  ;;  %p925_p8 = scmp.lt.s32.totalorder %s1301_s29, %s923_s12  ;;  %p926_p9 = scmp.lt.s32.totalorder %s924_s20, %s918_s9 }
  0x85   : > { %p921_p1 = pneg %p920_p12 }
  0x86   : > { %p927_p6 = por %p926_p9, %p925_p8 }
  0x88   : > { %p928_p13 = pnand %p927_p6, %p921_p1 }
 0x157   : > { %v385_v8 = vpop.f32.mrb[0].mxu0 }
 0x158   : > { %v731_v9 = vpop.f32.mrb[1].mxu0  ;;  %v393_v10 = vsel %vm392_vm3, %v385_v8, -inf }
 0x159   : > { %394 = vmax.xlane.f32.xlu0 %v393_v10  ;;  %v388_v11 = vpop.f32.mrb[2].mxu0 }
 0x15a   : > { %v732_v12 = vpop.f32.mrb[3].mxu0 }
 0x1e6   : > { %v395_v15 = vpop.xlane.xlu0 %394 }
 0x1e7   : > { %v396_v16 = vmax.f32 %v391_v14, %v395_v15 }
 0x1e9   : > { %v397_v17 = vsub.f32 %v391_v14, %v396_v16  ;;  %483 = vst.msk [vmem:[#allocation4] sm:$0xff] %vm332_vm2, %v396_v16  ;;  %402 = vperm.xlu0 %820, %v396_v16  }
 0x1eb   : > { %v398_v27 = vmul.f32 1.442695, %v397_v17 }
 0x268   : > { %v403_v21 = vpop.permute.xlu0 %402 }
 0x269   : > { %v405_v22 = vsub.f32 %v385_v8, %v403_v21 }
 0x26b   : > { %v406_v23 = vmul.f32 1.442695, %v405_v22 }
 0x26d   : > { %822 = vpow2.f32 %v406_v23 }
 0x26e   : > { %824 = vpow2.f32 %v398_v27 }
 0x277   : > { %v823_v24 = vpop.eup %822 }
 0x278   : > { %v420_v25 = vsel %vm392_vm3, %v823_v24, 0.0  ;;  %v433_v26 = vpack.c.bf16 %v823_v24, %v823_v24  ;;  %v825_v28 = vpop.eup %824 }
 0x279   : > { %421 = vadd.xlane.f32.xlu1 %v420_v25  ;;  %v419_v30 = vmul.f32 %v825_v28, %v418_v29 }
 0x27a   : > { %736 = vmatmul.mubr.msk.bf16.vlgmr.msra.gmra.mrb[0].mxu1 %vm392_vm3, %v433_v26 }
 0x28a   : > { %429 = vperm.xlu1 %821, %v825_v28  }
 0x306   : > { %v422_v31 = vpop.xlane.xlu1 %421 }
 0x307   : > { %v423_v32 = vadd.f32 %v422_v31, %v419_v30 }
 0x309   : > { %425 = vst.msk [vmem:[#allocation5] sm:$0xff] %vm332_vm2, %v423_v32 }
 0x30a   : > { %v430_v36 = vpop.permute.xlu1 %429 }
 0x30b   : > { %v432_v37 = vmul.f32 %v430_v36, %v426_v35 }
 0x310   : > { %v487_v33 = vld [vmem:[#allocation5] sm:$0xff] }
 0x311   : > { %826 = vrcp.f32 %v487_v33 }
 0x31b   : > { %v827_v34 = vpop.eup %826 }
 0x31c   : > { %493 = vperm.xlu1 %821, %v827_v34  }
 0x34d   : > { %v475_v38 = vpop.f32.mrb[0].mxu1 }
 0x34e   : > { %v481_v39 = vadd.f32 %v475_v38, %v432_v37  ;;  %v737_v40 = vpop.f32.mrb[1].mxu1 }
 0x34f   : > { %v478_v41 = vpop.f32.mrb[2].mxu1 }
 0x350   : > { %482 = vst.msk [vmem:[#allocation6] sm:$0xff] %vm335_vm0, %v481_v39  ;;  %v738_v42 = vpop.f32.mrb[3].mxu1 }
 0x357   : > { %v490_v43 = vld [vmem:[#allocation6] sm:$0xff] }
 0x39b   : > { %v494_v44 = vpop.permute.xlu1 %493 }
 0x39c   : > { %v496_v45 = vmul.f32 %v494_v44, %v490_v43  ;;  %v498_v46 = vmul.f32 %v823_v24, %v494_v44 }
 0x39e   : > { %497 = vst.msk [vmem:[%s319_s5] sm:$0xff] %vm335_vm0, %v496_v45 }
 0x39f   : > { %499 = vst.msk [vmem:[%s326_s14] sm:$0xff] %vm392_vm3, %v498_v46 }
 0x3a0   : > { %931 = shalt.err (!%p928_p13)
}
 0x3a1   : > { %s932_s19 = scalar_lea.hbm %s1299_s1, 128  ;;  %s936_s24 = scalar_lea.hbm %s1382_s3, 256 }
 0x3a2   : > { %p933_p11 = scmp.ne.s32.totalorder %s1299_s1, %s932_s19  ;;  %p937_p7 = scmp.lt.u32.totalorder %s1299_s1, %s1382_s3 }
 0x3a3   : > { %p938_p3 = scmp.lt.u32.totalorder %s936_s24, %s932_s19  ;;  %p940_p4 = scmp.lt.u32.totalorder %s932_s19, %s1299_s1 }
 0x3a4   : > { %p934_p2 = pnand %p933_p11, %p1411_p10 }
 0x3a5   : > { %p939_p0 = por %p938_p3, %p937_p7 }
 0x3a6   : > { %p935_p5 = pneg %p934_p2 }
 0x3a7   : > { %p941_p12 = por %p940_p4, %p939_p0 }
 0x3a9   : > { %p942_p1 = pnand %p941_p12, %p935_p5 }
 0x3ab   : > { %945 = shalt.err (!%p942_p1)
}
 0x3ac   : > { %745 = dma.vmem_to_hbm [thread:$0]  (%p1411_p10), %s1301_s29, 128, %s1299_s1, %s501_s6  }
 0x3ad   : > { %s506_s5 = scalar_lea.sflag [#allocation15], %s1264_s25  ;;  %s946_s14 = scalar_lea.vmem %s1308_s11, 128 }
 0x3ae   : > { %p947_p8 = scmp.ne.s32.totalorder %s1308_s11, %s946_s14  ;;  %s1046_s13 = smov [#allocation14]  }
 0x3af   : > { %s950_s26 = sshll.u32 %s1046_s13, 4  ;;  %s951_s26 = int_to_ptr.vmem [resolvable:$false] %s950_s26 }
 0x3b0   : > { %p948_p9 = pnand %p947_p8, %p1411_p10  ;;  %s952_s7 = scalar_lea.vmem %s951_s26, 256 }
 0x3b1   : > { %p953_p13 = scmp.lt.s32.totalorder %s1308_s11, %s951_s26  ;;  %p954_p11 = scmp.lt.s32.totalorder %s952_s7, %s946_s14 }
 0x3b2   : > { %p949_p6 = pneg %p948_p9 }
 0x3b3   : > { %p955_p2 = por %p954_p11, %p953_p13 }
 0x3b5   : > { %p956_p5 = pnand %p955_p2, %p949_p6 }
 0x3b7   : > { %959 = shalt.err (!%p956_p5)
}
 0x3b8   : > { %s960_s25 = scalar_lea.hbm %s1306_s18, 128  ;;  %s964_s23 = scalar_lea.hbm %s1383_s4, 256 }
 0x3b9   : > { %p961_p7 = scmp.ne.s32.totalorder %s1306_s18, %s960_s25  ;;  %p965_p4 = scmp.lt.u32.totalorder %s1306_s18, %s1383_s4 }
 0x3ba   : > { %p966_p12 = scmp.lt.u32.totalorder %s964_s23, %s960_s25  ;;  %p968_p8 = scmp.lt.u32.totalorder %s960_s25, %s1306_s18 }
 0x3bb   : > { %p962_p3 = pnand %p961_p7, %p1411_p10 }
 0x3bc   : > { %p967_p1 = por %p966_p12, %p965_p4 }
 0x3bd   : > { %p963_p0 = pneg %p962_p3 }
 0x3be   : > { %p969_p9 = por %p968_p8, %p967_p1 }
 0x3c0   : > { %p970_p6 = pnand %p969_p9, %p963_p0 }
 0x3c2   : > { %973 = shalt.err (!%p970_p6)
}
 0x3c3   : > { %746 = dma.vmem_to_hbm [thread:$0]  (%p1411_p10), %s1308_s11, 128, %s1306_s18, %s506_s5  }
 0x3c4 PF: > { %s1412_s10 = sld [smem:[#allocation21_spill]]  ;;  %s546_s12 = sand.u32 1, %s1016_s15  }
 0x3c5   : > { %p1413_p13 = scmp.ne.s32.totalorder %s1400_s30, 0  ;;  %s547_s20 = scalar_lea.sflag [#allocation9], %s546_s12 }
 0x3ca   : > { %p1414_p11 = scmp.ge.s32.totalorder %s1412_s10, 2 }
 0x3cc   : > { %p760_p2 = pnand %p1414_p11, %p1413_p13 }
 0x3ce   : > { %1007 = dma.done.wait (!%p760_p2), %s547_s20, 128  }
 0x3cf   : > { %1009 = vsyncadd (!%p760_p2), %s547_s20, 4294967168  ;;  %s556_s19 = scalar_lea.sflag [#allocation15], %s546_s12 }
 0x3d0   : > { %1011 = dma.done.wait (!%p760_p2), %s556_s19, 128  }
 0x3d1   : > { %1013 = vsyncadd (!%p760_p2), %s556_s19, 4294967168  ;;  %s27_s20 = sadd.s32 1, %s1412_s10   ;;  %s1415_s28 = sld [smem:[#allocation23_spill]] }
 0x3d2   : > { %p24_p5 = scmp.ge.s32.totalorder %s27_s20, 4   ;;  %s1416_s18 = sld [smem:[#allocation20_spill]] }
 0x3d3   : > { %s1417_s19 = sld [smem:[#allocation22_spill]]  ;;  %s1418_s15 = smov %s1020_s16 }
 0x3d4   : > { %s1419_s16 = smov %s1024_s17  ;;  %26 = sbr.rel (!%p24_p5) target bundleno = 12 (0xc), region = 132 }
 0x3d7   : > { %s1420_s17 = smov %s1415_s28 }
 0x3db   :  { %561 = vsyncpa [#allocation8], 1 }
 0x3dc   :  { %563 = vsyncpa [#allocation8 + $0x1], 1 }
 0x3dd   :  { %564 = vsyncpa [#allocation11], 1 }
 0x3de   :  { %566 = vsyncpa [#allocation11 + $0x1], 1 }
 0x3df   :  { %567 = vsyncpa [#allocation9], 1 }
 0x3e0   :  { %569 = vsyncpa [#allocation9 + $0x1], 1 }
 0x3e1   :  { %570 = vsyncpa [#allocation15], 1 }
 0x3e2   :  { %572 = vsyncpa [#allocation15 + $0x1], 1 }

</bundles_post_ra>
